<compile_context>
chip_gen: v6e
topology: v6e:2x2x1
jax: 0.10.0
libtpu: 0.0.40
codegen_flags: <defaults>
</compile_context>

<pallas_src>
import jax
import jax.numpy as jnp
from jax.experimental import pallas as pl
from jax.experimental.pallas import tpu as pltpu

_LANES = 128
_TARGET_BLOCK_BYTES = 4 * 1024 * 1024   # ~4 MiB of I/O per grid step


def _device_kind() -> str:
    try:
        return jax.devices()[0].device_kind.lower()
    except Exception:
        return ""


_KIND = _device_kind()
# v7x has 2 TensorCores per chip and only 64 MiB VMEM per TC; v5e/v6e have a
# single TC and 128 MiB of VMEM.
_IS_MULTI_TC = "v7" in _KIND
_VMEM_LIMIT_BYTES = (48 if _IS_MULTI_TC else 64) * 1024 * 1024


def _mish_kernel(x_ref, o_ref):
    x = x_ref[...].astype(jnp.float32)
    # tanh(softplus(x)) = ((1+t)^2 - 1) / ((1+t)^2 + 1) = t*(t+2) / (t*(t+2)+2)
    # with t = exp(x). Clamp x so t*(t+2) stays finite; for x >= 20 the ratio
    # is already exactly 1.0 in f32.
    t = jnp.exp(jnp.minimum(x, 20.0))
    num = t * (t + 2.0)
    den = num + 2.0
    r = pl.reciprocal(den, approx=True)   # cheap EUP vrcp
    r = r * (2.0 - den * r)               # one Newton step -> ~1-2 ulp in f32
    o_ref[...] = (x * num * r).astype(o_ref.dtype)


def _mish_jnp(x):
    # Pure-JAX Mish (numerically stable softplus); used for the tiny unaligned
    # tail and as the correctness reference.
    x32 = x.astype(jnp.float32)
    sp = jnp.maximum(x32, 0.0) + jnp.log1p(jnp.exp(-jnp.abs(x32)))
    return (x32 * jnp.tanh(sp)).astype(x.dtype)


def mish(x: jax.Array, *, block_rows=None) -> jax.Array:
    """Elementwise Mish: x * tanh(softplus(x)). Matches torch semantics."""
    orig_shape = x.shape
    orig_dtype = x.dtype
    total = x.size
    if total == 0:
        return x
    itemsize = jnp.dtype(orig_dtype).itemsize
    # Sublane granularity for this dtype (f32: 8, bf16: 16, int8/fp8: 32).
    min_rows = 8 * max(1, 4 // itemsize)

    x_flat = jnp.ravel(x)                     # free for contiguous inputs
    main = (total // _LANES) * _LANES         # 128-aligned prefix -> kernel
    tail = total - main

    if main == 0:
        # Fewer than 128 elements: a kernel launch is not worth it.
        return _mish_jnp(x_flat).reshape(orig_shape)

    rows = main // _LANES
    x2d = (x_flat[:main] if tail else x_flat).reshape(rows, _LANES)

    # Size blocks by bytes so per-step overhead is amortized for any dtype.
    if block_rows is None:
        block_rows = max(min_rows, _TARGET_BLOCK_BYTES // (_LANES * itemsize))
    tile_rows = min(block_rows, rows)
    # On multi-TC chips (v7x) ensure >= 2 blocks so both cores get work; on
    # single-TC chips (v5e/v6e) this split would be pure per-step overhead.
    if _IS_MULTI_TC and rows >= 2 * min_rows and pl.cdiv(rows, tile_rows) < 2:
        tile_rows = ((pl.cdiv(rows, 2) + min_rows - 1) // min_rows) * min_rows
    grid = (pl.cdiv(rows, tile_rows),)

    cost = pl.CostEstimate(
        flops=9 * main,
        transcendentals=2 * main,
        bytes_accessed=2 * main * itemsize,
    )

    dim_sem = (pltpu.CORE_PARALLEL,) if _IS_MULTI_TC else ("parallel",)
    # Note: on v7x, pipeline_mode=pl.Buffered(3) is worth a sweep if xprof
    # shows exposed DMA; unnecessary on v5e/v6e where steps are long enough.

    out2d = pl.pallas_call(
        _mish_kernel,
        out_shape=jax.ShapeDtypeStruct((rows, _LANES), orig_dtype),
        grid=grid,
        in_specs=[pl.BlockSpec((tile_rows, _LANES), lambda i: (i, 0))],
        out_specs=pl.BlockSpec((tile_rows, _LANES), lambda i: (i, 0)),
        compiler_params=pltpu.CompilerParams(
            dimension_semantics=dim_sem,
            vmem_limit_bytes=_VMEM_LIMIT_BYTES,
        ),
        cost_estimate=cost,
    )(x2d)

    out_flat = out2d.reshape(-1)
    if tail:
        out_flat = jnp.concatenate([out_flat, _mish_jnp(x_flat[main:])])
    return out_flat.reshape(orig_shape)


if __name__ == "__main__":
    key = jax.random.PRNGKey(0)

    # Spec-consistent small shape (NCHW): batch=2, channels=4, 16x16 spatial.
    x = jax.random.normal(key, (2, 4, 16, 16), dtype=jnp.float32) * 3.0
    y = jax.block_until_ready(mish(x))
    assert y.shape == x.shape and y.dtype == x.dtype
    assert jnp.allclose(y, _mish_jnp(x), atol=5e-5, rtol=5e-5)

    # 128-multiple, sublane-ragged case (rows=30; block equals full extent).
    x2 = jax.random.normal(jax.random.PRNGKey(1), (1, 3, 40, 32), jnp.float32) * 4.0
    y2 = jax.block_until_ready(mish(x2))
    assert jnp.allclose(y2, _mish_jnp(x2), atol=5e-5, rtol=5e-5)

    # Non-128-multiple size: 128-aligned prefix through the kernel, jnp tail.
    x3 = jax.random.normal(jax.random.PRNGKey(2), (3, 5, 7, 11), jnp.float32) * 3.0
    y3 = jax.block_until_ready(mish(x3))
    assert y3.shape == x3.shape
    assert jnp.allclose(y3, _mish_jnp(x3), atol=5e-5, rtol=5e-5)

    # bf16 I/O stays bf16 (half the HBM traffic); compute still f32 in-register.
    xb = (jax.random.normal(jax.random.PRNGKey(3), (2, 4, 16, 16)) * 3.0).astype(jnp.bfloat16)
    yb = jax.block_until_ready(mish(xb))
    assert yb.dtype == jnp.bfloat16
    assert jnp.allclose(yb.astype(jnp.float32), _mish_jnp(xb).astype(jnp.float32),
                        atol=1e-1, rtol=2e-2)

    # Multi-block pipelined path: one full 8192-row (4 MiB) block plus a ragged
    # 128-row last block (rows = 8320, grid = 2).
    x4 = jax.random.normal(jax.random.PRNGKey(4), (2, 13, 320, 128), jnp.float32)
    y4 = jax.block_until_ready(mish(x4))
    assert jnp.allclose(y4, _mish_jnp(x4), atol=5e-5, rtol=5e-5)

    print("KERNEL_OK")
</pallas_src>

<mosaic_0001>
module attributes {stable_mosaic.version = 11 : i64} {
  func.func @_mish_kernel(%arg0: i32, %arg1: memref<16x128xf32, #tpu.memory_space<vmem>>, %arg2: memref<16x128xf32, #tpu.memory_space<vmem>>) attributes {dimension_semantics = [#tpu.dimension_semantics<parallel>], iteration_bounds = array<i64: 1>, scalar_prefetch = 0 : i64, scratch_operands = 0 : i64, tpu.core_type = #tpu.core_type<tc>, window_params = [{transform_indices = @transform_0, window_bounds = array<i64: 16, 128>}, {transform_indices = @transform_1, window_bounds = array<i64: 16, 128>}]} {
    %c0 = arith.constant 0 : index
    %c0_0 = arith.constant 0 : index
    %0 = vector.load %arg1[%c0, %c0_0] : memref<16x128xf32, #tpu.memory_space<vmem>>, vector<16x128xf32>
    %cst = arith.constant 2.000000e+01 : f32
    %1 = vector.broadcast %cst : f32 to vector<16x128xf32>
    %2 = arith.minimumf %0, %1 : vector<16x128xf32>
    %3 = math.exp %2 : vector<16x128xf32>
    %cst_1 = arith.constant 2.000000e+00 : f32
    %4 = vector.broadcast %cst_1 : f32 to vector<16x128xf32>
    %5 = arith.addf %3, %4 : vector<16x128xf32>
    %6 = arith.mulf %3, %5 : vector<16x128xf32>
    %cst_2 = arith.constant 2.000000e+00 : f32
    %7 = vector.broadcast %cst_2 : f32 to vector<16x128xf32>
    %8 = arith.addf %6, %7 : vector<16x128xf32>
    %9 = tpu.reciprocal %8 {approx = true} : vector<16x128xf32> -> vector<16x128xf32>
    %10 = arith.mulf %8, %9 : vector<16x128xf32>
    %cst_3 = arith.constant 2.000000e+00 : f32
    %11 = vector.broadcast %cst_3 : f32 to vector<16x128xf32>
    %12 = arith.subf %11, %10 : vector<16x128xf32>
    %13 = arith.mulf %9, %12 : vector<16x128xf32>
    %14 = arith.mulf %0, %6 : vector<16x128xf32>
    %15 = arith.mulf %14, %13 : vector<16x128xf32>
    %c0_4 = arith.constant 0 : index
    %c0_5 = arith.constant 0 : index
    %16 = vector.load %arg2[%c0_4, %c0_5] : memref<16x128xf32, #tpu.memory_space<vmem>>, vector<16x128xf32>
    tpu.vector_store %arg2[%c0_4, %c0_5], %15 {strides = array<i32>} : memref<16x128xf32, #tpu.memory_space<vmem>>, vector<16x128xf32>,
    return
  }
  func.func @transform_0(%arg0: i32) -> (i32, i32) {
    %c0_i32 = arith.constant 0 : i32
    %c0_i32_0 = arith.constant 0 : i32
    return %arg0, %c0_i32 : i32, i32
  }
  func.func @transform_1(%arg0: i32) -> (i32, i32) {
    %c0_i32 = arith.constant 0 : i32
    %c0_i32_0 = arith.constant 0 : i32
    return %arg0, %c0_i32 : i32, i32
  }
}

</mosaic_0001>

<bundles_post_ra>
// kernel: tpu_custom_call.1
= control target key start
LH: loop header
LB: loop body
LE: loop exit
PB: predicated region body
PF: predicated region fallthrough
CT: control target
= control target key end

     0   :  { %6 = vsyncpa [#allocation3], 0  ;;  %s150_s0 = inlined_call_operand.hbm [shape: f32[16,128], index: 0, kind: input, shape index: {}]   ;;  %s151_s1 = inlined_call_operand.hbm [shape: f32[16,128], index: 1, kind: output, shape index: {}]  }
   0x1   :  { %7 = vsyncpa [#allocation4], 0  ;;  %s124_s6 = smov [#allocation2]  }
   0x2   :  { %s13_s7 = sshll.u32 %s124_s6, 4  ;;  %s14_s7 = int_to_ptr.vmem [resolvable:$true] %s13_s7 }
   0x3   :  { %s88_s8 = scalar_lea.vmem %s14_s7, 256  ;;  %p93_p1 = scmp.lt.s32.totalorder %s14_s7, %s14_s7 }
   0x4   :  { %p89_p0 = scmp.ne.s32.totalorder %s14_s7, %s88_s8  ;;  %p94_p2 = scmp.lt.s32.totalorder %s88_s8, %s88_s8 }
   0x6   :  { %p95_p3 = por %p94_p2, %p93_p1 }
   0x8   :  { %p96_p4 = pnand %p95_p3, %p89_p0 }
   0xa   :  { %99 = shalt.err (!%p96_p4)
}
   0xb   :  { %s125_s9 = smov 128   ;;  %s126_s10 = smov 8  }
   0xc   :  { %19 = dma.hbm_to_vmem [thread:$0]  %s150_s0, 256, %s14_s7, [#allocation3], %s125_s9, %s125_s9, %s126_s10  }
   0xd   :  { %120 = dma.done.wait [#allocation3], 256  }
   0xe   :  { %121 = vsyncadd [#allocation3], 4294967040  ;;  %v23_v0 = vld [vmem:[#allocation2] sm:$0xff]  ;;  %v24_v1 = vld [vmem:[#allocation2 + $0x8] sm:$0xff]  ;;  %s127_s0 = smov [#allocation5]  }
   0xf   :  { %v25_v2 = vmin.f32 %v23_v0, 20.0  ;;  %v26_v3 = vmin.f32 %v24_v1, 20.0  ;;  %s56_s13 = sshll.u32 %s127_s0, 4  ;;  %s57_s13 = int_to_ptr.vmem [resolvable:$true] %s56_s13 }
  0x10   :  { %s100_s14 = scalar_lea.vmem %s57_s13, 256  ;;  %p105_p6 = scmp.lt.s32.totalorder %s57_s13, %s57_s13 }
  0x11   :  { %v27_v4 = vmul.f32 1.442695, %v25_v2  ;;  %v29_v5 = vmul.f32 1.442695, %v26_v3  ;;  %p101_p5 = scmp.ne.s32.totalorder %s57_s13, %s100_s14  ;;  %p106_p7 = scmp.lt.s32.totalorder %s100_s14, %s100_s14 }
  0x13   :  { %72 = vpow2.f32 %v27_v4  ;;  %p107_p8 = por %p106_p7, %p105_p6 }
  0x14   :  { %74 = vpow2.f32 %v29_v5 }
  0x15   :  { %p108_p9 = pnand %p107_p8, %p101_p5 }
  0x20   :  { %v73_v6 = vpop.eup %72 }
  0x21   :  { %v75_v7 = vpop.eup %74  ;;  %v31_v8 = vadd.f32 2.0, %v73_v6 }
  0x22   :  { %v32_v9 = vadd.f32 2.0, %v75_v7 }
  0x23   :  { %v33_v10 = vmul.f32 %v73_v6, %v31_v8 }
  0x24   :  { %v34_v11 = vmul.f32 %v75_v7, %v32_v9 }
  0x25   :  { %v35_v12 = vadd.f32 2.0, %v33_v10  ;;  %v45_v19 = vmul.f32 %v33_v10, %v23_v0 }
  0x26   :  { %v36_v13 = vadd.f32 2.0, %v34_v11  ;;  %v46_v21 = vmul.f32 %v34_v11, %v24_v1 }
  0x27   :  { %76 = vrcp.f32 %v35_v12 }
  0x28   :  { %78 = vrcp.f32 %v36_v13 }
  0x34   :  { %v77_v14 = vpop.eup %76 }
  0x35   :  { %v79_v15 = vpop.eup %78  ;;  %v39_v16 = vmul.f32 %v77_v14, %v35_v12 }
  0x36   :  { %v40_v17 = vmul.f32 %v79_v15, %v36_v13 }
  0x37   :  { %v41_v18 = vsub.f32 2.0, %v39_v16 }
  0x38   :  { %v42_v20 = vsub.f32 2.0, %v40_v17 }
  0x39   :  { %v43_v22 = vmul.f32 %v77_v14, %v41_v18 }
  0x3a   :  { %v44_v23 = vmul.f32 %v79_v15, %v42_v20 }
  0x3b   :  { %v47_v24 = vmul.f32 %v45_v19, %v43_v22 }
  0x3c   :  { %v48_v25 = vmul.f32 %v46_v21, %v44_v23 }
  0x3d   :  { %49 = vst [vmem:[#allocation5] sm:$0xff] %v47_v24 }
  0x3e   :  { %50 = vst [vmem:[#allocation5 + $0x8] sm:$0xff] %v48_v25 }
  0x3f   :  { %111 = shalt.err (!%p108_p9)
}
  0x40   :  { %62 = dma.vmem_to_hbm [thread:$0]  %s57_s13, 256, %s151_s1, [#allocation4], %s125_s9, %s125_s9, %s126_s10  }
  0x41   :  { %122 = dma.done.wait [#allocation4], 256  }
  0x42   :  { %123 = vsyncadd [#allocation4], 4294967040 }
  0x43   :  { %66 = vsyncpa [#allocation3], 1 }
  0x44   :  { %67 = vsyncpa [#allocation4], 1 }

</bundles_post_ra>
